<compile_context>
chip_gen: v7x
topology: tpu7x:2x2x1
jax: 0.10.0
libtpu: 0.0.40
codegen_flags: <defaults>
</compile_context>

<pallas_src>
import jax
import jax.numpy as jnp
from jax import lax
from jax.experimental import pallas as pl
from jax.experimental.pallas import tpu as pltpu

B, C_IN, C_OUT, H, W = 2, 4, 8, 16, 16
K = 3                      # depthwise kernel size
EPS = 1e-5                 # BatchNorm eps (PyTorch default)
HW = H * W                 # 256 pixels per image
N_PIX = B * HW             # 512 -> lane-dense (4 full 128-lane vregs per sublane row)

assert H & (H - 1) == 0 and W & (W - 1) == 0, "kernel assumes power-of-two H, W"
_LOG2_W = W.bit_length() - 1

# ---- parameter-slab column layout: one (C_OUT, 128) f32 VMEM tile -----------
_PW = 0                            # BSConvU.pw 1x1 weights        cols [0, 4)
_XC = _PW + C_IN                   # x_correct grouped-1x1 (dense) cols [4, 8)
_DW = _XC + C_IN                   # 3x3 depthwise weights         cols [8, 17)
_DWB = _DW + K * K                 # depthwise bias                col 17
_G1, _B1 = _DWB + 1, _DWB + 2      # main-path BN gamma / beta     cols 18, 19
_XCB = _DWB + 3                    # x_correct bias                col 20
_G2, _B2 = _DWB + 4, _DWB + 5      # x_correct BN gamma / beta     cols 21, 22
P_COLS = 128


def residual_block_kernel(
    x_ref,   # (B, C_IN, HW)    VMEM  activations (free reshape of NCHW input)
    p_ref,   # (C_OUT, 128)     VMEM  packed parameter slab (single tile)
    o_ref,   # (B, C_OUT, HW)   VMEM  output (free reshape back to NCHW outside)
):
    # Lane-dense working slab (C_IN, B*H*W): concat batch along lanes
    # (offsets are multiples of 128 -> pure vreg placement, no lane shifts).
    x2d = jnp.concatenate([x_ref[b] for b in range(B)], axis=-1)   # (C_IN, N_PIX)
    p = p_ref[...]                                                  # (C_OUT, 128)

    # ---- both 1x1 convs as C_IN unrolled broadcast-FMA passes (VPU, no MXU) --
    y = jnp.zeros((C_OUT, N_PIX), jnp.float32)    # BSConvU.pw output
    xc = jnp.zeros((C_OUT, N_PIX), jnp.float32)   # x_correct conv output
    for ci in range(C_IN):
        xrow = x2d[ci:ci + 1, :]                               # (1, N_PIX)
        y = y + p[:, _PW + ci:_PW + ci + 1] * xrow
        xc = xc + p[:, _XC + ci:_XC + ci + 1] * xrow
    xc = xc + p[:, _XCB:_XCB + 1]

    # ---- flattened-position -> (h, w) boundary masks (power-of-two bit ops) --
    pos = lax.broadcasted_iota(jnp.int32, (1, N_PIX), 1)
    w_idx = jnp.bitwise_and(pos, W - 1)                            # pos %  W
    h_idx = jnp.bitwise_and(jnp.right_shift(pos, _LOG2_W), H - 1)  # (pos // W) % H
    h_ok = {-1: h_idx >= 1, 1: h_idx < H - 1}
    w_ok = {-1: w_idx >= 1, 1: w_idx < W - 1}

    def maskf(dh, dwd):
        if dh == 0 and dwd == 0:
            return None
        if dh == 0:
            return w_ok[dwd].astype(jnp.float32)
        if dwd == 0:
            return h_ok[dh].astype(jnp.float32)
        return jnp.logical_and(h_ok[dh], w_ok[dwd]).astype(jnp.float32)

    # ---- BSConvU.dw : 3x3 depthwise conv via XLU lane rotations --------------
    # Boundary (row / image / batch wrap) handling is folded into the per-tap
    # weight broadcast instead of a separate select on the rolled activations.
    acc = jnp.zeros((C_OUT, N_PIX), jnp.float32)
    for kh in range(K):
        for kw in range(K):
            dh, dwd = kh - 1, kw - 1
            off = dh * W + dwd                    # flat offset of the source pixel
            tap = y if off == 0 else pltpu.roll(y, (-off) % N_PIX, 1)
            k = _DW + kh * K + kw
            wk = p[:, k:k + 1]                    # (C_OUT, 1) broadcasts along lanes
            m = maskf(dh, dwd)
            if m is not None:
                wk = wk * m                       # (C_OUT, N_PIX) masked weight
            acc = acc + wk * tap
    z = acc + p[:, _DWB:_DWB + 1]

    inv_n = jnp.float32(1.0 / N_PIX)

    # ---- BatchNorms folded to per-channel scale/shift (train-mode stats) -----
    # one-pass biased variance: E[z^2] - mu^2 (f32 accumulation).
    mu1 = jnp.sum(z, axis=-1, keepdims=True) * inv_n
    var1 = jnp.sum(z * z, axis=-1, keepdims=True) * inv_n - mu1 * mu1
    s1 = p[:, _G1:_G1 + 1] * lax.rsqrt(var1 + EPS)
    t1 = p[:, _B1:_B1 + 1] - mu1 * s1
    main = jnp.maximum(z * s1 + t1, 0.0)

    mu2 = jnp.sum(xc, axis=-1, keepdims=True) * inv_n
    var2 = jnp.sum(xc * xc, axis=-1, keepdims=True) * inv_n - mu2 * mu2
    s2 = p[:, _G2:_G2 + 1] * lax.rsqrt(var2 + EPS)
    t2 = p[:, _B2:_B2 + 1] - mu2 * s2

    # ---- residual add; full-vreg unmasked stores, per-batch slabs ------------
    out = (main + (xc * s2 + t2)).astype(o_ref.dtype)              # (C_OUT, N_PIX)
    for b in range(B):
        o_ref[b] = out[:, b * HW:(b + 1) * HW]


def pack_params(params):
    """Parameter-only preprocessing (scatter + packing). Run ONCE, outside the
    per-step jit, so no per-call scatter/reshape HLOs surround the kernel."""
    pw_w, dw_w, dw_b, bn1_g, bn1_b, xc_w, xc_b, bn2_g, bn2_b = params
    f32 = lambda v: jnp.asarray(v, jnp.float32)
    # Grouped-1x1 (groups = gcd(4, 8) = 4): out channel o reads in channel
    # o // (C_OUT // C_IN). Scatter into a dense (C_OUT, C_IN) matrix so the
    # grouped conv shares the same broadcast-FMA loop as the pointwise conv.
    gmap = jnp.arange(C_OUT) // (C_OUT // C_IN)
    xc_w_mat = jnp.zeros((C_OUT, C_IN), jnp.float32).at[
        jnp.arange(C_OUT), gmap].set(f32(xc_w))

    slab = jnp.zeros((C_OUT, P_COLS), jnp.float32)
    slab = slab.at[:, _PW:_PW + C_IN].set(f32(pw_w))
    slab = slab.at[:, _XC:_XC + C_IN].set(xc_w_mat)
    slab = slab.at[:, _DW:_DW + K * K].set(f32(dw_w))
    slab = slab.at[:, _DWB].set(f32(dw_b))
    slab = slab.at[:, _G1].set(f32(bn1_g))
    slab = slab.at[:, _B1].set(f32(bn1_b))
    slab = slab.at[:, _XCB].set(f32(xc_b))
    slab = slab.at[:, _G2].set(f32(bn2_g))
    slab = slab.at[:, _B2].set(f32(bn2_b))
    return slab


@jax.jit
def residual_block(x, param_slab):
    vmem = pl.BlockSpec(memory_space=pltpu.MemorySpace.VMEM)
    x3 = x.reshape(B, C_IN, HW)        # free reshape (no transpose HLO)
    out3 = pl.pallas_call(
        residual_block_kernel,
        out_shape=jax.ShapeDtypeStruct((B, C_OUT, HW), jnp.float32),
        in_specs=[vmem, vmem],
        out_specs=vmem,
    )(x3, param_slab)
    return out3.reshape(B, C_OUT, H, W)  # free reshape back to NCHW


# TODO(synk): at this problem size (~20 KiB footprint) the call is overhead-bound;
# for real deployments fuse several ResidualBlocks / a larger batch per pallas_call
# and add a leading batch/block grid axis with dimension_semantics=("parallel",...)
# so v7x's two TensorCores are both used (size blocks against its 64 MiB VMEM);
# keep blocks coarse on single-TC v5e/v6e.


# ---------------- pure-JAX reference (for correctness check) ----------------
def reference(x, pw_w, dw_w, dw_b, bn1_g, bn1_b, xc_w, xc_b, bn2_g, bn2_b):
    dn = ("NCHW", "OIHW", "NCHW")
    y = lax.conv_general_dilated(x, pw_w.reshape(C_OUT, C_IN, 1, 1),
                                 (1, 1), "VALID", dimension_numbers=dn)
    z = lax.conv_general_dilated(y, dw_w.reshape(C_OUT, 1, K, K),
                                 (1, 1), [(1, 1), (1, 1)], dimension_numbers=dn,
                                 feature_group_count=C_OUT)
    z = z + dw_b.reshape(1, C_OUT, 1, 1)
    mu = jnp.mean(z, axis=(0, 2, 3), keepdims=True)
    var = jnp.mean((z - mu) ** 2, axis=(0, 2, 3), keepdims=True)
    zn = (z - mu) * lax.rsqrt(var + EPS) * bn1_g.reshape(1, -1, 1, 1) + bn1_b.reshape(1, -1, 1, 1)
    main = jnp.maximum(zn, 0.0)

    xc = lax.conv_general_dilated(x, xc_w.reshape(C_OUT, 1, 1, 1),
                                  (1, 1), "VALID", dimension_numbers=dn,
                                  feature_group_count=4)
    xc = xc + xc_b.reshape(1, C_OUT, 1, 1)
    mu2 = jnp.mean(xc, axis=(0, 2, 3), keepdims=True)
    var2 = jnp.mean((xc - mu2) ** 2, axis=(0, 2, 3), keepdims=True)
    xcn = (xc - mu2) * lax.rsqrt(var2 + EPS) * bn2_g.reshape(1, -1, 1, 1) + bn2_b.reshape(1, -1, 1, 1)
    return main + xcn


if __name__ == "__main__":
    key = jax.random.PRNGKey(0)
    ks = jax.random.split(key, 10)
    # Deterministic synthetic parameters (shapes per the module __init__).
    x     = jax.random.normal(ks[0], (B, C_IN, H, W), jnp.float32)
    pw_w  = 0.5 * jax.random.normal(ks[1], (C_OUT, C_IN), jnp.float32)   # pw: (8,4,1,1)
    dw_w  = 0.3 * jax.random.normal(ks[2], (C_OUT, K * K), jnp.float32)  # dw: (8,1,3,3)
    dw_b  = 0.1 * jax.random.normal(ks[3], (C_OUT,), jnp.float32)
    bn1_g = 1.0 + 0.1 * jax.random.normal(ks[4], (C_OUT,), jnp.float32)
    bn1_b = 0.1 * jax.random.normal(ks[5], (C_OUT,), jnp.float32)
    xc_w  = 0.5 * jax.random.normal(ks[6], (C_OUT,), jnp.float32)        # x_correct: (8,1,1,1)
    xc_b  = 0.1 * jax.random.normal(ks[7], (C_OUT,), jnp.float32)
    bn2_g = 1.0 + 0.1 * jax.random.normal(ks[8], (C_OUT,), jnp.float32)
    bn2_b = 0.1 * jax.random.normal(ks[9], (C_OUT,), jnp.float32)

    params = (pw_w, dw_w, dw_b, bn1_g, bn1_b, xc_w, xc_b, bn2_g, bn2_b)

    # Pack parameters ONCE (outside the per-step jitted function).
    param_slab = jax.block_until_ready(pack_params(params))

    out = residual_block(x, param_slab)
    jax.block_until_ready(out)

    ref = reference(x, *params)
    err = float(jnp.max(jnp.abs(out - ref)))
    assert jnp.allclose(out, ref, atol=2e-3, rtol=2e-3), f"max abs err = {err}"

    # TODO(synk): kernel is specialized to the default config (repeats=1, stride=1,
    # uniform k=3/dilation=1, BSConvU, train-mode BN); transpose-conv / multi-repeat
    # variants of the module are config-dependent and not covered here. BN
    # running_mean/running_var side-effect updates are not produced.
    print("KERNEL_OK")
</pallas_src>

<mosaic_0001>
module attributes {stable_mosaic.version = 11 : i64} {
  func.func @residual_block_kernel(%arg0: memref<2x4x256xf32, #tpu.memory_space<vmem>>, %arg1: memref<8x128xf32, #tpu.memory_space<vmem>>, %arg2: memref<2x8x256xf32, #tpu.memory_space<vmem>>) attributes {dimension_semantics = [], scalar_prefetch = 0 : i64, scratch_operands = 0 : i64, tpu.core_type = #tpu.core_type<tc>} {
    %c0 = arith.constant 0 : index
    %c0_0 = arith.constant 0 : index
    %c0_1 = arith.constant 0 : index
    %0 = vector.load %arg0[%c0, %c0_0, %c0_1] : memref<2x4x256xf32, #tpu.memory_space<vmem>>, vector<1x4x256xf32>
    %1 = vector.shape_cast %0 : vector<1x4x256xf32> to vector<4x256xf32>
    %c1 = arith.constant 1 : index
    %c0_2 = arith.constant 0 : index
    %c0_3 = arith.constant 0 : index
    %2 = vector.load %arg0[%c1, %c0_2, %c0_3] : memref<2x4x256xf32, #tpu.memory_space<vmem>>, vector<1x4x256xf32>
    %3 = vector.shape_cast %2 : vector<1x4x256xf32> to vector<4x256xf32>
    %4 = tpu.concatenate %1, %3 in 1 : vector<4x256xf32>, vector<4x256xf32> -> vector<4x512xf32>
    %c0_4 = arith.constant 0 : index
    %c0_5 = arith.constant 0 : index
    %5 = vector.load %arg1[%c0_4, %c0_5] : memref<8x128xf32, #tpu.memory_space<vmem>>, vector<8x128xf32>
    %cst = arith.constant 0.000000e+00 : f32
    %6 = vector.broadcast %cst : f32 to vector<8x512xf32>
    %cst_6 = arith.constant 0.000000e+00 : f32
    %7 = vector.broadcast %cst_6 : f32 to vector<8x512xf32>
    %8 = vector.extract_strided_slice %4 {offsets = [0, 0], sizes = [1, 512], strides = [1, 1]} : vector<4x512xf32> to vector<1x512xf32>
    %9 = vector.extract_strided_slice %5 {offsets = [0, 0], sizes = [8, 1], strides = [1, 1]} : vector<8x128xf32> to vector<8x1xf32>
    %10 = vector.broadcast %9 : vector<8x1xf32> to vector<8x512xf32>
    %11 = vector.broadcast %8 : vector<1x512xf32> to vector<8x512xf32>
    %12 = arith.mulf %10, %11 : vector<8x512xf32>
    %13 = arith.addf %6, %12 : vector<8x512xf32>
    %14 = vector.extract_strided_slice %5 {offsets = [0, 4], sizes = [8, 1], strides = [1, 1]} : vector<8x128xf32> to vector<8x1xf32>
    %15 = vector.broadcast %14 : vector<8x1xf32> to vector<8x512xf32>
    %16 = vector.broadcast %8 : vector<1x512xf32> to vector<8x512xf32>
    %17 = arith.mulf %15, %16 : vector<8x512xf32>
    %18 = arith.addf %7, %17 : vector<8x512xf32>
    %19 = vector.extract_strided_slice %4 {offsets = [1, 0], sizes = [1, 512], strides = [1, 1]} : vector<4x512xf32> to vector<1x512xf32>
    %20 = vector.extract_strided_slice %5 {offsets = [0, 1], sizes = [8, 1], strides = [1, 1]} : vector<8x128xf32> to vector<8x1xf32>
    %21 = vector.broadcast %20 : vector<8x1xf32> to vector<8x512xf32>
    %22 = vector.broadcast %19 : vector<1x512xf32> to vector<8x512xf32>
    %23 = arith.mulf %21, %22 : vector<8x512xf32>
    %24 = arith.addf %13, %23 : vector<8x512xf32>
    %25 = vector.extract_strided_slice %5 {offsets = [0, 5], sizes = [8, 1], strides = [1, 1]} : vector<8x128xf32> to vector<8x1xf32>
    %26 = vector.broadcast %25 : vector<8x1xf32> to vector<8x512xf32>
    %27 = vector.broadcast %19 : vector<1x512xf32> to vector<8x512xf32>
    %28 = arith.mulf %26, %27 : vector<8x512xf32>
    %29 = arith.addf %18, %28 : vector<8x512xf32>
    %30 = vector.extract_strided_slice %4 {offsets = [2, 0], sizes = [1, 512], strides = [1, 1]} : vector<4x512xf32> to vector<1x512xf32>
    %31 = vector.extract_strided_slice %5 {offsets = [0, 2], sizes = [8, 1], strides = [1, 1]} : vector<8x128xf32> to vector<8x1xf32>
    %32 = vector.broadcast %31 : vector<8x1xf32> to vector<8x512xf32>
    %33 = vector.broadcast %30 : vector<1x512xf32> to vector<8x512xf32>
    %34 = arith.mulf %32, %33 : vector<8x512xf32>
    %35 = arith.addf %24, %34 : vector<8x512xf32>
    %36 = vector.extract_strided_slice %5 {offsets = [0, 6], sizes = [8, 1], strides = [1, 1]} : vector<8x128xf32> to vector<8x1xf32>
    %37 = vector.broadcast %36 : vector<8x1xf32> to vector<8x512xf32>
    %38 = vector.broadcast %30 : vector<1x512xf32> to vector<8x512xf32>
    %39 = arith.mulf %37, %38 : vector<8x512xf32>
    %40 = arith.addf %29, %39 : vector<8x512xf32>
    %41 = vector.extract_strided_slice %4 {offsets = [3, 0], sizes = [1, 512], strides = [1, 1]} : vector<4x512xf32> to vector<1x512xf32>
    %42 = vector.extract_strided_slice %5 {offsets = [0, 3], sizes = [8, 1], strides = [1, 1]} : vector<8x128xf32> to vector<8x1xf32>
    %43 = vector.broadcast %42 : vector<8x1xf32> to vector<8x512xf32>
    %44 = vector.broadcast %41 : vector<1x512xf32> to vector<8x512xf32>
    %45 = arith.mulf %43, %44 : vector<8x512xf32>
    %46 = arith.addf %35, %45 : vector<8x512xf32>
    %47 = vector.extract_strided_slice %5 {offsets = [0, 7], sizes = [8, 1], strides = [1, 1]} : vector<8x128xf32> to vector<8x1xf32>
    %48 = vector.broadcast %47 : vector<8x1xf32> to vector<8x512xf32>
    %49 = vector.broadcast %41 : vector<1x512xf32> to vector<8x512xf32>
    %50 = arith.mulf %48, %49 : vector<8x512xf32>
    %51 = arith.addf %40, %50 : vector<8x512xf32>
    %52 = vector.extract_strided_slice %5 {offsets = [0, 20], sizes = [8, 1], strides = [1, 1]} : vector<8x128xf32> to vector<8x1xf32>
    %53 = vector.broadcast %52 : vector<8x1xf32> to vector<8x512xf32>
    %54 = arith.addf %51, %53 : vector<8x512xf32>
    %55 = tpu.iota {dimensions = array<i32: 1>} : vector<1x512xi32>
    %c15_i32 = arith.constant 15 : i32
    %56 = vector.broadcast %c15_i32 : i32 to vector<1x512xi32>
    %57 = arith.andi %55, %56 : vector<1x512xi32>
    %c4_i32 = arith.constant 4 : i32
    %58 = vector.broadcast %c4_i32 : i32 to vector<1x512xi32>
    %59 = arith.shrsi %55, %58 : vector<1x512xi32>
    %c15_i32_7 = arith.constant 15 : i32
    %60 = vector.broadcast %c15_i32_7 : i32 to vector<1x512xi32>
    %61 = arith.andi %59, %60 : vector<1x512xi32>
    %c1_i32 = arith.constant 1 : i32
    %62 = vector.broadcast %c1_i32 : i32 to vector<1x512xi32>
    %63 = arith.cmpi sge, %61, %62 : vector<1x512xi32>
    %c15_i32_8 = arith.constant 15 : i32
    %64 = vector.broadcast %c15_i32_8 : i32 to vector<1x512xi32>
    %65 = arith.cmpi slt, %61, %64 : vector<1x512xi32>
    %c1_i32_9 = arith.constant 1 : i32
    %66 = vector.broadcast %c1_i32_9 : i32 to vector<1x512xi32>
    %67 = arith.cmpi sge, %57, %66 : vector<1x512xi32>
    %c15_i32_10 = arith.constant 15 : i32
    %68 = vector.broadcast %c15_i32_10 : i32 to vector<1x512xi32>
    %69 = arith.cmpi slt, %57, %68 : vector<1x512xi32>
    %cst_11 = arith.constant 0.000000e+00 : f32
    %70 = vector.broadcast %cst_11 : f32 to vector<8x512xf32>
    %c17_i32 = arith.constant 17 : i32
    %71 = tpu.dynamic_rotate %46 by %c17_i32 dim 1 : vector<8x512xf32>, i32 -> vector<8x512xf32>
    %72 = vector.extract_strided_slice %5 {offsets = [0, 8], sizes = [8, 1], strides = [1, 1]} : vector<8x128xf32> to vector<8x1xf32>
    %73 = arith.andi %63, %67 : vector<1x512xi1>
    %74 = arith.extui %73 : vector<1x512xi1> to vector<1x512xi32>
    %75 = arith.sitofp %74 : vector<1x512xi32> to vector<1x512xf32>
    %76 = vector.broadcast %72 : vector<8x1xf32> to vector<8x512xf32>
    %77 = vector.broadcast %75 : vector<1x512xf32> to vector<8x512xf32>
    %78 = arith.mulf %76, %77 : vector<8x512xf32>
    %79 = arith.mulf %78, %71 : vector<8x512xf32>
    %80 = arith.addf %70, %79 : vector<8x512xf32>
    %c16_i32 = arith.constant 16 : i32
    %81 = tpu.dynamic_rotate %46 by %c16_i32 dim 1 : vector<8x512xf32>, i32 -> vector<8x512xf32>
    %82 = vector.extract_strided_slice %5 {offsets = [0, 9], sizes = [8, 1], strides = [1, 1]} : vector<8x128xf32> to vector<8x1xf32>
    %83 = arith.extui %63 : vector<1x512xi1> to vector<1x512xi32>
    %84 = arith.sitofp %83 : vector<1x512xi32> to vector<1x512xf32>
    %85 = vector.broadcast %82 : vector<8x1xf32> to vector<8x512xf32>
    %86 = vector.broadcast %84 : vector<1x512xf32> to vector<8x512xf32>
    %87 = arith.mulf %85, %86 : vector<8x512xf32>
    %88 = arith.mulf %87, %81 : vector<8x512xf32>
    %89 = arith.addf %80, %88 : vector<8x512xf32>
    %c15_i32_12 = arith.constant 15 : i32
    %90 = tpu.dynamic_rotate %46 by %c15_i32_12 dim 1 : vector<8x512xf32>, i32 -> vector<8x512xf32>
    %91 = vector.extract_strided_slice %5 {offsets = [0, 10], sizes = [8, 1], strides = [1, 1]} : vector<8x128xf32> to vector<8x1xf32>
    %92 = arith.andi %63, %69 : vector<1x512xi1>
    %93 = arith.extui %92 : vector<1x512xi1> to vector<1x512xi32>
    %94 = arith.sitofp %93 : vector<1x512xi32> to vector<1x512xf32>
    %95 = vector.broadcast %91 : vector<8x1xf32> to vector<8x512xf32>
    %96 = vector.broadcast %94 : vector<1x512xf32> to vector<8x512xf32>
    %97 = arith.mulf %95, %96 : vector<8x512xf32>
    %98 = arith.mulf %97, %90 : vector<8x512xf32>
    %99 = arith.addf %89, %98 : vector<8x512xf32>
    %c1_i32_13 = arith.constant 1 : i32
    %100 = tpu.dynamic_rotate %46 by %c1_i32_13 dim 1 : vector<8x512xf32>, i32 -> vector<8x512xf32>
    %101 = vector.extract_strided_slice %5 {offsets = [0, 11], sizes = [8, 1], strides = [1, 1]} : vector<8x128xf32> to vector<8x1xf32>
    %102 = arith.extui %67 : vector<1x512xi1> to vector<1x512xi32>
    %103 = arith.sitofp %102 : vector<1x512xi32> to vector<1x512xf32>
    %104 = vector.broadcast %101 : vector<8x1xf32> to vector<8x512xf32>
    %105 = vector.broadcast %103 : vector<1x512xf32> to vector<8x512xf32>
    %106 = arith.mulf %104, %105 : vector<8x512xf32>
    %107 = arith.mulf %106, %100 : vector<8x512xf32>
    %108 = arith.addf %99, %107 : vector<8x512xf32>
    %109 = vector.extract_strided_slice %5 {offsets = [0, 12], sizes = [8, 1], strides = [1, 1]} : vector<8x128xf32> to vector<8x1xf32>
    %110 = vector.broadcast %109 : vector<8x1xf32> to vector<8x512xf32>
    %111 = arith.mulf %110, %46 : vector<8x512xf32>
    %112 = arith.addf %108, %111 : vector<8x512xf32>
    %c511_i32 = arith.constant 511 : i32
    %113 = tpu.dynamic_rotate %46 by %c511_i32 dim 1 : vector<8x512xf32>, i32 -> vector<8x512xf32>
    %114 = vector.extract_strided_slice %5 {offsets = [0, 13], sizes = [8, 1], strides = [1, 1]} : vector<8x128xf32> to vector<8x1xf32>
    %115 = arith.extui %69 : vector<1x512xi1> to vector<1x512xi32>
    %116 = arith.sitofp %115 : vector<1x512xi32> to vector<1x512xf32>
    %117 = vector.broadcast %114 : vector<8x1xf32> to vector<8x512xf32>
    %118 = vector.broadcast %116 : vector<1x512xf32> to vector<8x512xf32>
    %119 = arith.mulf %117, %118 : vector<8x512xf32>
    %120 = arith.mulf %119, %113 : vector<8x512xf32>
    %121 = arith.addf %112, %120 : vector<8x512xf32>
    %c497_i32 = arith.constant 497 : i32
    %122 = tpu.dynamic_rotate %46 by %c497_i32 dim 1 : vector<8x512xf32>, i32 -> vector<8x512xf32>
    %123 = vector.extract_strided_slice %5 {offsets = [0, 14], sizes = [8, 1], strides = [1, 1]} : vector<8x128xf32> to vector<8x1xf32>
    %124 = arith.andi %65, %67 : vector<1x512xi1>
    %125 = arith.extui %124 : vector<1x512xi1> to vector<1x512xi32>
    %126 = arith.sitofp %125 : vector<1x512xi32> to vector<1x512xf32>
    %127 = vector.broadcast %123 : vector<8x1xf32> to vector<8x512xf32>
    %128 = vector.broadcast %126 : vector<1x512xf32> to vector<8x512xf32>
    %129 = arith.mulf %127, %128 : vector<8x512xf32>
    %130 = arith.mulf %129, %122 : vector<8x512xf32>
    %131 = arith.addf %121, %130 : vector<8x512xf32>
    %c496_i32 = arith.constant 496 : i32
    %132 = tpu.dynamic_rotate %46 by %c496_i32 dim 1 : vector<8x512xf32>, i32 -> vector<8x512xf32>
    %133 = vector.extract_strided_slice %5 {offsets = [0, 15], sizes = [8, 1], strides = [1, 1]} : vector<8x128xf32> to vector<8x1xf32>
    %134 = arith.extui %65 : vector<1x512xi1> to vector<1x512xi32>
    %135 = arith.sitofp %134 : vector<1x512xi32> to vector<1x512xf32>
    %136 = vector.broadcast %133 : vector<8x1xf32> to vector<8x512xf32>
    %137 = vector.broadcast %135 : vector<1x512xf32> to vector<8x512xf32>
    %138 = arith.mulf %136, %137 : vector<8x512xf32>
    %139 = arith.mulf %138, %132 : vector<8x512xf32>
    %140 = arith.addf %131, %139 : vector<8x512xf32>
    %c495_i32 = arith.constant 495 : i32
    %141 = tpu.dynamic_rotate %46 by %c495_i32 dim 1 : vector<8x512xf32>, i32 -> vector<8x512xf32>
    %142 = vector.extract_strided_slice %5 {offsets = [0, 16], sizes = [8, 1], strides = [1, 1]} : vector<8x128xf32> to vector<8x1xf32>
    %143 = arith.andi %65, %69 : vector<1x512xi1>
    %144 = arith.extui %143 : vector<1x512xi1> to vector<1x512xi32>
    %145 = arith.sitofp %144 : vector<1x512xi32> to vector<1x512xf32>
    %146 = vector.broadcast %142 : vector<8x1xf32> to vector<8x512xf32>
    %147 = vector.broadcast %145 : vector<1x512xf32> to vector<8x512xf32>
    %148 = arith.mulf %146, %147 : vector<8x512xf32>
    %149 = arith.mulf %148, %141 : vector<8x512xf32>
    %150 = arith.addf %140, %149 : vector<8x512xf32>
    %151 = vector.extract_strided_slice %5 {offsets = [0, 17], sizes = [8, 1], strides = [1, 1]} : vector<8x128xf32> to vector<8x1xf32>
    %152 = vector.broadcast %151 : vector<8x1xf32> to vector<8x512xf32>
    %153 = arith.addf %150, %152 : vector<8x512xf32>
    %cst_14 = arith.constant dense<0.000000e+00> : vector<8xf32>
    %154 = vector.multi_reduction <add>, %153, %cst_14 [1] : vector<8x512xf32> to vector<8xf32>
    %155 = vector.shape_cast %154 : vector<8xf32> to vector<8x1xf32>
    %cst_15 = arith.constant 0.001953125 : f32
    %156 = vector.broadcast %cst_15 : f32 to vector<8x1xf32>
    %157 = arith.mulf %155, %156 : vector<8x1xf32>
    %158 = arith.mulf %153, %153 : vector<8x512xf32>
    %cst_16 = arith.constant dense<0.000000e+00> : vector<8xf32>
    %159 = vector.multi_reduction <add>, %158, %cst_16 [1] : vector<8x512xf32> to vector<8xf32>
    %160 = vector.shape_cast %159 : vector<8xf32> to vector<8x1xf32>
    %cst_17 = arith.constant 0.001953125 : f32
    %161 = vector.broadcast %cst_17 : f32 to vector<8x1xf32>
    %162 = arith.mulf %160, %161 : vector<8x1xf32>
    %163 = arith.mulf %157, %157 : vector<8x1xf32>
    %164 = arith.subf %162, %163 : vector<8x1xf32>
    %165 = vector.extract_strided_slice %5 {offsets = [0, 18], sizes = [8, 1], strides = [1, 1]} : vector<8x128xf32> to vector<8x1xf32>
    %cst_18 = arith.constant 9.99999974E-6 : f32
    %166 = vector.broadcast %cst_18 : f32 to vector<8x1xf32>
    %167 = arith.addf %164, %166 : vector<8x1xf32>
    %168 = math.rsqrt %167 : vector<8x1xf32>
    %169 = arith.mulf %165, %168 : vector<8x1xf32>
    %170 = vector.extract_strided_slice %5 {offsets = [0, 19], sizes = [8, 1], strides = [1, 1]} : vector<8x128xf32> to vector<8x1xf32>
    %171 = arith.mulf %157, %169 : vector<8x1xf32>
    %172 = arith.subf %170, %171 : vector<8x1xf32>
    %173 = vector.broadcast %169 : vector<8x1xf32> to vector<8x512xf32>
    %174 = arith.mulf %153, %173 : vector<8x512xf32>
    %175 = vector.broadcast %172 : vector<8x1xf32> to vector<8x512xf32>
    %176 = arith.addf %174, %175 : vector<8x512xf32>
    %cst_19 = arith.constant 0.000000e+00 : f32
    %177 = vector.broadcast %cst_19 : f32 to vector<8x512xf32>
    %178 = arith.maximumf %176, %177 : vector<8x512xf32>
    %cst_20 = arith.constant dense<0.000000e+00> : vector<8xf32>
    %179 = vector.multi_reduction <add>, %54, %cst_20 [1] : vector<8x512xf32> to vector<8xf32>
    %180 = vector.shape_cast %179 : vector<8xf32> to vector<8x1xf32>
    %cst_21 = arith.constant 0.001953125 : f32
    %181 = vector.broadcast %cst_21 : f32 to vector<8x1xf32>
    %182 = arith.mulf %180, %181 : vector<8x1xf32>
    %183 = arith.mulf %54, %54 : vector<8x512xf32>
    %cst_22 = arith.constant dense<0.000000e+00> : vector<8xf32>
    %184 = vector.multi_reduction <add>, %183, %cst_22 [1] : vector<8x512xf32> to vector<8xf32>
    %185 = vector.shape_cast %184 : vector<8xf32> to vector<8x1xf32>
    %cst_23 = arith.constant 0.001953125 : f32
    %186 = vector.broadcast %cst_23 : f32 to vector<8x1xf32>
    %187 = arith.mulf %185, %186 : vector<8x1xf32>
    %188 = arith.mulf %182, %182 : vector<8x1xf32>
    %189 = arith.subf %187, %188 : vector<8x1xf32>
    %190 = vector.extract_strided_slice %5 {offsets = [0, 21], sizes = [8, 1], strides = [1, 1]} : vector<8x128xf32> to vector<8x1xf32>
    %cst_24 = arith.constant 9.99999974E-6 : f32
    %191 = vector.broadcast %cst_24 : f32 to vector<8x1xf32>
    %192 = arith.addf %189, %191 : vector<8x1xf32>
    %193 = math.rsqrt %192 : vector<8x1xf32>
    %194 = arith.mulf %190, %193 : vector<8x1xf32>
    %195 = vector.extract_strided_slice %5 {offsets = [0, 22], sizes = [8, 1], strides = [1, 1]} : vector<8x128xf32> to vector<8x1xf32>
    %196 = arith.mulf %182, %194 : vector<8x1xf32>
    %197 = arith.subf %195, %196 : vector<8x1xf32>
    %198 = vector.broadcast %194 : vector<8x1xf32> to vector<8x512xf32>
    %199 = arith.mulf %54, %198 : vector<8x512xf32>
    %200 = vector.broadcast %197 : vector<8x1xf32> to vector<8x512xf32>
    %201 = arith.addf %199, %200 : vector<8x512xf32>
    %202 = arith.addf %178, %201 : vector<8x512xf32>
    %203 = vector.extract_strided_slice %202 {offsets = [0, 0], sizes = [8, 256], strides = [1, 1]} : vector<8x512xf32> to vector<8x256xf32>
    %c0_25 = arith.constant 0 : index
    %c0_26 = arith.constant 0 : index
    %c0_27 = arith.constant 0 : index
    %204 = vector.load %arg2[%c0_25, %c0_26, %c0_27] : memref<2x8x256xf32, #tpu.memory_space<vmem>>, vector<1x8x256xf32>
    %205 = vector.shape_cast %204 : vector<1x8x256xf32> to vector<8x256xf32>
    %206 = vector.shape_cast %203 : vector<8x256xf32> to vector<1x8x256xf32>
    tpu.vector_store %arg2[%c0_25, %c0_26, %c0_27], %206 {strides = array<i32>} : memref<2x8x256xf32, #tpu.memory_space<vmem>>, vector<1x8x256xf32>,
    %207 = vector.extract_strided_slice %202 {offsets = [0, 256], sizes = [8, 256], strides = [1, 1]} : vector<8x512xf32> to vector<8x256xf32>
    %c1_28 = arith.constant 1 : index
    %c0_29 = arith.constant 0 : index
    %c0_30 = arith.constant 0 : index
    %208 = vector.load %arg2[%c1_28, %c0_29, %c0_30] : memref<2x8x256xf32, #tpu.memory_space<vmem>>, vector<1x8x256xf32>
    %209 = vector.shape_cast %208 : vector<1x8x256xf32> to vector<8x256xf32>
    %210 = vector.shape_cast %207 : vector<8x256xf32> to vector<1x8x256xf32>
    tpu.vector_store %arg2[%c1_28, %c0_29, %c0_30], %210 {strides = array<i32>} : memref<2x8x256xf32, #tpu.memory_space<vmem>>, vector<1x8x256xf32>,
    return
  }
}

</mosaic_0001>

<bundles_post_ra>
// kernel: residual_block.1
= control target key start
LH: loop header
LB: loop body
LE: loop exit
PB: predicated region body
PF: predicated region fallthrough
CT: control target
= control target key end

     0   :  { %v760_v0 = vmov 0   ;;  %v761_v2 = vmov 2   ;;  %v762_v3 = vmov 1   ;;  %v763_v4 = vmov 3   ;;  %s781_s15 = smov 16   ;;  %s782_s16 = smov 15   ;;  %s1428_s1 = inlined_call_operand.vmem [shape: f32[8,128], index: 1, kind: input, shape index: {}]   ;;  %s1429_s0 = inlined_call_operand.vmem [shape: f32[2,4,256], index: 0, kind: input, shape index: {}]   ;;  %s1430_s2 = inlined_call_operand.vmem [shape: f32[2,8,256], index: 2, kind: output, shape index: {}]  }
   0x1   :  { %729 = vset.pattern.permute.xlu0 %v760_v0  ;;  %v810_v1 = vld [vmem:[%s1428_s1] sm:$0xff]  ;;  %731 = vset.pattern.permute.xlu1 %v761_v2  ;;  %v764_v5 = vmov 9   ;;  %v765_v6 = vmov 8   ;;  %v766_v7 = vmov 12   ;;  %v767_v8 = vmov 10   ;;  %v662_v32 = vld [vmem:[%s1429_s0 + $0x8] sm:$0xff] }
   0x2   :  { %1441 = vst [vmem:[#allocation2_spill] sm:$0xff] %v810_v1  ;;  %23 = vperm.xlu0 %729, %v810_v1   ;;  %103 = vperm.xlu1 %731, %v810_v1   ;;  %v768_v9 = vmov 11   ;;  %v769_v10 = vmov 14   ;;  %v770_v11 = vmov 13   ;;  %v771_v12 = vmov 15   ;;  %v11_v29 = vld [vmem:[%s1429_s0] sm:$0xff] }
   0x3   :  { %v772_v13 = vmov 4   ;;  %v773_v14 = vmov 6   ;;  %v774_v15 = vmov 5   ;;  %v775_v16 = vmov 17   ;;  %s780_s0 = smov 17   ;;  %s783_s17 = smov 1  }
   0x4   :  { %v776_v17 = vmov 16   ;;  %v777_v18 = vmov 7   ;;  %v778_v19 = vmov 20   ;;  %v26_v20 = vlaneseq  ;;  %s784_s18 = smov 127   ;;  %s785_s19 = smov 113  }
   0x5   :  { %v15_v38 = vcombine.high %v11_v29, %v11_v29  ;;  %v18_v40 = vcombine.high %v662_v32, %v662_v32  ;;  %v1442_v42 = vmov 0  ;;  %s786_s20 = smov 112   ;;  %s787_s21 = smov 111  }
   0x6   :  { %730 = vset.pattern.permute.xlu0 %v762_v3  ;;  %732 = vset.pattern.permute.xlu1 %v763_v4  ;;  %v831_v21 = vand.u32 127, %v26_v20  ;;  %v27_v27 = vshrl.u32 %v26_v20, 7 }
   0x7   :  { %63 = vperm.xlu0 %730, %v810_v1   ;;  %143 = vperm.xlu1 %732, %v810_v1  }
   0x8   :  { %v192_v22 = vadd.s32 128, %v831_v21  ;;  %v193_v23 = vadd.s32 256, %v831_v21  ;;  %v199_v25 = vshra.s32 %v831_v21, 4  ;;  %v837_v28 = vadd.s32 384, %v831_v21 }
   0x9   :  { %v195_v33 = vand.u32 15, %v831_v21  ;;  %v28_v37 = vsub.s32 0, %v27_v27  ;;  %v108_v41 = vsub.s32 2, %v27_v27  ;;  %v68_v43 = vsub.s32 1, %v27_v27 }
   0xa   :  { %v200_v24 = vshra.s32 %v192_v22, 4  ;;  %v201_v26 = vshra.s32 %v193_v23, 4  ;;  %v196_v30 = vand.u32 15, %v192_v22  ;;  %v848_v34 = vand.u32 15, %v199_v25 }
   0xb   :  { %734 = vset.pattern.permute.xlu0 %v764_v5  ;;  %733 = vset.pattern.permute.xlu1 %v765_v6  ;;  %v197_v36 = vand.u32 15, %v193_v23  ;;  %v202_v39 = vshra.s32 %v837_v28, 4  ;;  %vm859_vm3 = vcmp.ge.s32.totalorder %v195_v33, 1  ;;  %v148_v45 = vsub.s32 3, %v27_v27 }
   0xc   :  { %286 = vperm.xlu0 %734, %v810_v1   ;;  %249 = vperm.xlu1 %733, %v810_v1   ;;  %v842_v31 = vand.u32 15, %v200_v24  ;;  %v850_v35 = vand.u32 15, %v201_v26  ;;  %vm854_vm1 = vcmp.ge.s32.totalorder %v196_v30, 1  ;;  %vm207_vm2 = vcmp.ge.s32.totalorder %v848_v34, 1 }
   0xd   :  { %v1443_v42 = vsel %vm854_vm1, 4294967295, %v1442_v42  ;;  %vm864_vm5 = vcmp.ge.s32.totalorder %v197_v36, 1  ;;  %v868_v47 = vrot.slane %v11_v29, %v28_v37  ;;  %v870_v48 = vrot.slane %v15_v38, %v28_v37  ;;  %vm894_vm7 = vmand %vm207_vm2, %vm859_vm3 }
   0xe   :  { %vm208_vm0 = vcmp.ge.s32.totalorder %v842_v31, 1  ;;  %1444 = vst [vmem:[#allocation3_spill] sm:$0xff] %v1443_v42  ;;  %vm1431_vm4 = vcmp.ge.s32.totalorder %v850_v35, 1  ;;  %v872_v49 = vrot.slane %v662_v32, %v28_v37  ;;  %v882_v51 = vand.u32 15, %v202_v39 }
   0xf   :  { %vm878_vm6 = vmand %vm208_vm0, %vm854_vm1  ;;  %v884_v52 = vrot.slane %v18_v40, %v28_v37  ;;  %v886_v53 = vrot.slane %v11_v29, %v108_v41  ;;  %v888_v54 = vrot.slane %v15_v38, %v108_v41  ;;  %v198_v56 = vand.u32 15, %v837_v28 }
  0x10   :  { %737 = vset.pattern.permute.xlu0 %v766_v7  ;;  %735 = vset.pattern.permute.xlu1 %v767_v8  ;;  %v899_v59 = vrot.slane %v662_v32, %v108_v41  ;;  %v901_v60 = vrot.slane %v18_v40, %v108_v41  ;;  %v903_v61 = vrot.slane %v11_v29, %v68_v43  ;;  %vm238_vm8 = vmand %vm1431_vm4, %vm864_vm5  ;;  %vm210_vm9 = vcmp.ge.s32.totalorder %v882_v51, 1 }
  0x11   :  { %380 = vperm.xlu0 %737, %v810_v1   ;;  %327 = vperm.xlu1 %735, %v810_v1   ;;  %v909_v62 = vrot.slane %v15_v38, %v68_v43  ;;  %v911_v63 = vrot.slane %v662_v32, %v68_v43  ;;  %v913_v0 = vrot.slane %v18_v40, %v68_v43  ;;  %v1434_v6 = vmov 0.0  }
  0x12   :  { %v915_v2 = vrot.slane %v11_v29, %v148_v45  ;;  %v917_v3 = vrot.slane %v15_v38, %v148_v45  ;;  %v919_v4 = vrot.slane %v662_v32, %v148_v45  ;;  %v921_v5 = vrot.slane %v18_v40, %v148_v45 }
  0x13   :  { %v664_v7 = vsel %vm878_vm6, 1.0, %v1434_v6  ;;  %v663_v8 = vsel %vm894_vm7, 1.0, %v1434_v6  ;;  %vm930_vm10 = vcmp.ge.s32.totalorder %v198_v56, 1  ;;  %vm936_vm11 = vcmp.lt.s32.totalorder %v196_v30, 15 }
  0x14   :  { %vm940_vm12 = vcmp.lt.s32.totalorder %v195_v33, 15  ;;  %vm944_vm13 = vcmp.lt.s32.totalorder %v197_v36, 15  ;;  %vm239_vm14 = vmand %vm210_vm9, %vm930_vm10  ;;  %v670_v38 = vsel %vm210_vm9, 1.0, %v1434_v6  ;;  %vm977_vm6 = vcmp.lt.s32.totalorder %v198_v56, 15 }
  0x15   :  { %736 = vset.pattern.permute.xlu1 %v768_v9  ;;  %739 = vset.pattern.permute.xlu0 %v769_v10  ;;  %v665_v10 = vsel %vm238_vm8, 1.0, %v1434_v6  ;;  %v666_v39 = vsel %vm239_vm14, 1.0, %v1434_v6  ;;  %vm973_vm15 = vmand %vm208_vm0, %vm936_vm11  ;;  %v676_v40 = vsel %vm854_vm1, 1.0, %v1434_v6  ;;  %v678_v46 = vsel %vm930_vm10, 1.0, %v1434_v6 }
  0x16   :  { %364 = vperm.xlu1 %736, %v810_v1   ;;  %454 = vperm.xlu0 %739, %v810_v1   ;;  %vm988_vm7 = vmand %vm207_vm2, %vm940_vm12 }
  0x17   :  { %vm316_vm8 = vmand %vm1431_vm4, %vm944_vm13  ;;  %vm213_vm4 = vcmp.lt.s32.totalorder %v850_v35, 15 }
  0x18   :  { %vm317_vm14 = vmand %vm210_vm9, %vm977_vm6  ;;  %vm214_vm9 = vcmp.lt.s32.totalorder %v882_v51, 15 }
  0x1a   :  { %738 = vset.pattern.permute.xlu1 %v770_v11  ;;  %740 = vset.pattern.permute.xlu0 %v771_v12 }
  0x1b   :  { %413 = vperm.xlu1 %738, %v810_v1   ;;  %491 = vperm.xlu0 %740, %v810_v1  }
  0x1f   :  { %741 = vset.pattern.permute.xlu1 %v772_v13  ;;  %744 = vset.pattern.permute.xlu0 %v773_v14 }
  0x20   :  { %51 = vperm.xlu1 %741, %v810_v1   ;;  %131 = vperm.xlu0 %744, %v810_v1  }
  0x24   :  { %742 = vset.pattern.permute.xlu1 %v774_v15  ;;  %746 = vset.pattern.permute.xlu0 %v775_v16 }
  0x25   :  { %91 = vperm.xlu1 %742, %v810_v1   ;;  %548 = vperm.xlu0 %746, %v810_v1  }
  0x29   :  { %743 = vset.pattern.permute.xlu1 %v776_v17 }
  0x2a   :  { %532 = vperm.xlu1 %743, %v810_v1  }
  0x2e   :  { %745 = vset.pattern.permute.xlu1 %v777_v18 }
  0x2f   :  { %171 = vperm.xlu1 %745, %v810_v1  }
  0x33   :  { %747 = vset.pattern.permute.xlu1 %v778_v19 }
  0x34   :  { %183 = vperm.xlu1 %747, %v810_v1  }
  0x81   :  { %v24_v57 = vpop.permute.xlu0 %23  ;;  %v104_v58 = vpop.permute.xlu1 %103 }
  0x82   :  { %v42_v11 = vmul.f32 %v868_v47, %v24_v57  ;;  %v43_v15 = vmul.f32 %v870_v48, %v24_v57  ;;  %v44_v16 = vmul.f32 %v872_v49, %v24_v57  ;;  %v45_v17 = vmul.f32 %v884_v52, %v24_v57 }
  0x83   :  { %v122_v18 = vmul.f32 %v886_v53, %v104_v58  ;;  %v123_v26 = vmul.f32 %v888_v54, %v104_v58  ;;  %v124_v27 = vmul.f32 %v899_v59, %v104_v58  ;;  %v125_v37 = vmul.f32 %v901_v60, %v104_v58 }
  0x86   :  { %v64_v19 = vpop.permute.xlu0 %63  ;;  %v144_v20 = vpop.permute.xlu1 %143 }
  0x87   :  { %v82_v22 = vmul.f32 %v903_v61, %v64_v19  ;;  %v83_v23 = vmul.f32 %v909_v62, %v64_v19  ;;  %v84_v24 = vmul.f32 %v911_v63, %v64_v19  ;;  %v85_v25 = vmul.f32 %v913_v0, %v64_v19 }
  0x88   :  { %v162_v28 = vmul.f32 %v915_v2, %v144_v20  ;;  %v163_v29 = vmul.f32 %v917_v3, %v144_v20  ;;  %v164_v55 = vmul.f32 %v919_v4, %v144_v20 }
  0x89   :  { %v86_v30 = vadd.f32 %v82_v22, %v42_v11  ;;  %v87_v32 = vadd.f32 %v83_v23, %v43_v15  ;;  %v88_v33 = vadd.f32 %v84_v24, %v44_v16  ;;  %v89_v36 = vadd.f32 %v85_v25, %v45_v17 }
  0x8a   :  { %v165_v17 = vmul.f32 %v921_v5, %v144_v20  ;;  %v672_v20 = vsel %vm973_vm15, 1.0, %v1434_v6  ;;  %v673_v24 = vsel %vm316_vm8, 1.0, %v1434_v6  ;;  %vm444_vm15 = vmand %vm214_vm9, %vm930_vm10  ;;  %vm212_vm10 = vcmp.lt.s32.totalorder %v842_v31, 15 }
  0x8b   :  { %v126_v43 = vadd.f32 %v122_v18, %v86_v30  ;;  %v127_v45 = vadd.f32 %v123_v26, %v87_v32  ;;  %v128_v50 = vadd.f32 %v124_v27, %v88_v33  ;;  %v982_v57 = vpop.permute.xlu0 %286  ;;  %v250_v58 = vpop.permute.xlu1 %249  ;;  %v129_v16 = vadd.f32 %v125_v37, %v89_v36 }
  0x8c   :  { %v992_v56 = vmul.f32 %v664_v7, %v250_v58  ;;  %v994_v15 = vmul.f32 %v663_v8, %v250_v58  ;;  %v1010_v7 = vmul.f32 %v670_v38, %v982_v57  ;;  %v1012_v8 = vmul.f32 %v665_v10, %v250_v58 }
  0x8d   :  { %v1001_v18 = vadd.f32 %v162_v28, %v126_v43  ;;  %v1003_v19 = vadd.f32 %v163_v29, %v127_v45  ;;  %v1014_v22 = vmul.f32 %v666_v39, %v250_v58  ;;  %v1016_v23 = vadd.f32 %v164_v55, %v128_v50 }
  0x8e   :  { %v671_v10 = vsel %vm988_vm7, 1.0, %v1434_v6  ;;  %v674_v27 = vsel %vm317_vm14, 1.0, %v1434_v6  ;;  %v1034_v28 = vadd.f32 %v165_v17, %v129_v16  ;;  %v677_v37 = vsel %vm864_vm5, 1.0, %v1434_v6  ;;  %vm443_vm7 = vmand %vm213_vm4, %vm864_vm5 }
  0x8f   :  { %223 = vrot.lane.b32.xlu0 %v1001_v18, %s780_s0  ;;  %225 = vrot.lane.b32.xlu1 %v1003_v19, %s780_s0  ;;  %v675_v43 = vsel %vm859_vm3, 1.0, %v1434_v6  ;;  %v686_v45 = vsel %vm444_vm15, 1.0, %v1434_v6  ;;  %v685_v58 = vsel %vm443_vm7, 1.0, %v1434_v6  ;;  %vm211_vm5 = vcmp.lt.s32.totalorder %v848_v34, 15  ;;  %vm520_vm14 = vmand %vm212_vm10, %vm936_vm11 }
  0x90   :  { %v1029_v25 = vpop.permute.xlu0 %380  ;;  %v328_v26 = vpop.permute.xlu1 %327  ;;  %vm519_vm8 = vmand %vm211_vm5, %vm940_vm12  ;;  %vm399_vm15 = vcmp.lt.s32.totalorder %v831_v21, 127 }
  0x91   :  { %v1038_v29 = vmul.f32 %v1029_v25, %v1001_v18  ;;  %v1042_v30 = vmul.f32 %v1029_v25, %v1003_v19  ;;  %v1046_v32 = vmul.f32 %v1029_v25, %v1016_v23  ;;  %v1052_v33 = vmul.f32 %v672_v20, %v328_v26  ;;  %vm441_vm7 = vmand %vm211_vm5, %vm859_vm3 }
  0x92   :  { %v1054_v36 = vmul.f32 %v671_v10, %v328_v26  ;;  %v1059_v38 = vmul.f32 %v673_v24, %v328_v26  ;;  %v1068_v39 = vmul.f32 %v674_v27, %v328_v26  ;;  %v681_v10 = vsel %vm944_vm13, 1.0, %v1434_v6  ;;  %vm442_vm3 = vmand %vm212_vm10, %vm854_vm1 }
  0x93   :  { %229 = vrot.lane.b32.xlu0 %v1034_v28, %s780_s0  ;;  %264 = vrot.lane.b32.xlu1 %v1001_v18, %s781_s15  ;;  %v682_v24 = vsel %vm977_vm6, 1.0, %v1434_v6  ;;  %v679_v26 = vsel %vm940_vm12, 1.0, %v1434_v6  ;;  %vm521_vm12 = vmand %vm213_vm4, %vm944_vm13  ;;  %vm231_vm13 = vcmp.lt.s32.totalorder %v831_v21, 17  ;;  %vm477_vm1 = vcmp.lt.s32.totalorder %v831_v21, 112 }
  0x95   :  { %v365_v50 = vpop.permute.xlu1 %364  ;;  %v1080_v55 = vpop.permute.xlu0 %454 }
  0x96   :  { %1467 = vst [vmem:[#allocation4_spill] sm:$0xff] %v1080_v55  ;;  %v1083_v11 = vmul.f32 %v677_v37, %v365_v50  ;;  %v1085_v16 = vmul.f32 %v676_v40, %v365_v50  ;;  %v1087_v17 = vmul.f32 %v675_v43, %v365_v50  ;;  %v1089_v20 = vmul.f32 %v678_v46, %v365_v50 }
  0x97   :  { %266 = vrot.lane.b32.xlu0 %v1003_v19, %s781_s15  ;;  %270 = vrot.lane.b32.xlu1 %v1034_v28, %s781_s15  ;;  %v1094_v9 = vmul.f32 %v686_v45, %v1080_v55  ;;  %v1106_v27 = vmul.f32 %v685_v58, %v1080_v55  ;;  %v680_v37 = vsel %vm936_vm11, 1.0, %v1434_v6  ;;  %v690_v46 = vsel %vm214_vm9, 1.0, %v1434_v6  ;;  %vm522_vm11 = vmand %vm214_vm9, %vm977_vm6 }
  0x98   :  { %vm272_vm6 = vcmp.lt.s32.totalorder %v831_v21, 16  ;;  %vm350_vm9 = vcmp.lt.s32.totalorder %v831_v21, 1 }
  0x99   :  { %1468 = vst [vmem:[#allocation5_spill] sm:$0xff] %v1094_v9  ;;  %1469 = vst [vmem:[#allocation6_spill] sm:$0xff] %v1106_v27 }
  0x9a   :  { %v414_v40 = vpop.permute.xlu1 %413  ;;  %v1111_v43 = vpop.permute.xlu0 %491 }
  0x9b   :  { %1470 = vst [vmem:[#allocation7_spill] sm:$0xff] %v1111_v43  ;;  %268 = vrot.lane.b32.xlu0 %v1016_v23, %s781_s15  ;;  %227 = vrot.lane.b32.xlu1 %v1016_v23, %s780_s0  ;;  %v1119_v45 = vmul.f32 %v681_v10, %v414_v40  ;;  %v1121_v50 = vmul.f32 %v682_v24, %v414_v40 }
  0x9c   :  { %v1123_v58 = vmul.f32 %v679_v26, %v414_v40  ;;  %v1125_v1 = vmul.f32 %v680_v37, %v414_v40  ;;  %v1128_v27 = vmul.f32 %v690_v46, %v1111_v43 }
  0x9e   :  { %1471 = vst [vmem:[#allocation8_spill] sm:$0xff] %v1128_v27 }
  0x9f   :  { %303 = vrot.lane.b32.xlu0 %v1003_v19, %s782_s16  ;;  %301 = vrot.lane.b32.xlu1 %v1001_v18, %s782_s16  ;;  %v52_v6 = vpop.permute.xlu1 %51  ;;  %v132_v40 = vpop.permute.xlu0 %131 }
  0xa0   :  { %v54_v10 = vmul.f32 %v52_v6, %v868_v47  ;;  %v55_v24 = vmul.f32 %v52_v6, %v870_v48  ;;  %v56_v26 = vmul.f32 %v52_v6, %v872_v49  ;;  %v57_v37 = vmul.f32 %v52_v6, %v884_v52 }
  0xa1   :  { %v136_v46 = vmul.f32 %v132_v40, %v899_v59  ;;  %v137_v27 = vmul.f32 %v132_v40, %v901_v60  ;;  %v134_v48 = vmul.f32 %v132_v40, %v886_v53  ;;  %v135_v49 = vmul.f32 %v132_v40, %v888_v54 }
  0xa2   :  { %v1472_v53 = vmov 0.0  }
  0xa3   :  { %344 = vrot.lane.b32.xlu0 %v1003_v19, %s783_s17  ;;  %307 = vrot.lane.b32.xlu1 %v1034_v28, %s782_s16  ;;  %v691_v54 = vsel %vm519_vm8, 1.0, %v1472_v53  ;;  %v692_v12 = vsel %vm520_vm14, 1.0, %v1472_v53  ;;  %v694_v14 = vsel %vm522_vm11, 1.0, %v1472_v53  ;;  %vm436_vm8 = vcmp.lt.s32.totalorder %v831_v21, 113 }
  0xa4   :  { %v92_v47 = vpop.permute.xlu1 %91 }
  0xa5   :  { %v94_v52 = vmul.f32 %v92_v47, %v903_v61  ;;  %v95_v59 = vmul.f32 %v92_v47, %v909_v62  ;;  %v96_v60 = vmul.f32 %v92_v47, %v911_v63  ;;  %v97_v6 = vmul.f32 %v92_v47, %v913_v0 }
  0xa6   :  { %v693_v0 = vsel %vm521_vm12, 1.0, %v1472_v53 }
  0xa7   :  { %346 = vrot.lane.b32.xlu0 %v1016_v23, %s783_s17  ;;  %305 = vrot.lane.b32.xlu1 %v1016_v23, %s782_s16  ;;  %v98_v61 = vadd.f32 %v94_v52, %v54_v10  ;;  %v99_v62 = vadd.f32 %v95_v59, %v55_v24  ;;  %v100_v63 = vadd.f32 %v96_v60, %v56_v26 }
  0xa8   :  { %v101_v13 = vadd.f32 %v97_v6, %v57_v37  ;;  %v668_v6 = vsel %vm208_vm0, 1.0, %v1472_v53  ;;  %vm1473_vm0 = vcmp.ge.s32.totalorder %v850_v35, 1 }
  0xa9   :  { %v533_v51 = vpop.permute.xlu1 %532  ;;  %v138_v41 = vadd.f32 %v134_v48, %v98_v61  ;;  %v139_v40 = vadd.f32 %v135_v49, %v99_v62  ;;  %v140_v47 = vadd.f32 %v136_v46, %v100_v63  ;;  %v290_v61 = vmul.f32 %v668_v6, %v982_v57 }
  0xaa   :  { %v141_v43 = vadd.f32 %v137_v27, %v101_v13  ;;  %v1176_v9 = vmul.f32 %v691_v54, %v533_v51  ;;  %v1178_v55 = vmul.f32 %v692_v12, %v533_v51  ;;  %v1180_v42 = vmul.f32 %v693_v0, %v533_v51 }
  0xab   :  { %395 = vrot.lane.b32.xlu0 %v1016_v23, %s784_s18  ;;  %342 = vrot.lane.b32.xlu1 %v1001_v18, %s783_s17  ;;  %v1185_v10 = vmul.f32 %v694_v14, %v533_v51  ;;  %v667_v54 = vsel %vm207_vm2, 1.0, %v1472_v53  ;;  %v669_v14 = vsel %vm1473_vm0, 1.0, %v1472_v53  ;;  %vm309_vm2 = vcmp.lt.s32.totalorder %v831_v21, 15 }
  0xac   :  { %v289_v62 = vmul.f32 %v667_v54, %v982_v57 }
  0xae   :  { %v172_v24 = vpop.permute.xlu1 %171 }
  0xaf   :  { %397 = vrot.lane.b32.xlu0 %v1034_v28, %s784_s18  ;;  %348 = vrot.lane.b32.xlu1 %v1034_v28, %s783_s17  ;;  %v174_v27 = vmul.f32 %v172_v24, %v915_v2  ;;  %v175_v26 = vmul.f32 %v172_v24, %v917_v3  ;;  %v176_v37 = vmul.f32 %v172_v24, %v919_v4  ;;  %v1216_v2 = vpop.permute.xlu0 %548 }
  0xb0   :  { %v177_v46 = vmul.f32 %v172_v24, %v921_v5 }
  0xb1   :  { %v1194_v48 = vadd.f32 %v174_v27, %v138_v41  ;;  %v1196_v49 = vadd.f32 %v175_v26, %v139_v40  ;;  %v1198_v52 = vadd.f32 %v176_v37, %v140_v47  ;;  %v291_v47 = vmul.f32 %v669_v14, %v982_v57 }
  0xb2   :  { %v1200_v59 = vadd.f32 %v177_v46, %v141_v43 }
  0xb3   :  { %430 = vrot.lane.b32.xlu0 %v1003_v19, %s785_s19  ;;  %391 = vrot.lane.b32.xlu1 %v1001_v18, %s784_s18  ;;  %v1218_v3 = vpop.permute.xlu1 %183 }
  0xb7   :  { %434 = vrot.lane.b32.xlu0 %v1034_v28, %s785_s19  ;;  %393 = vrot.lane.b32.xlu1 %v1003_v19, %s784_s18 }
  0xbb   :  { %471 = vrot.lane.b32.xlu0 %v1003_v19, %s786_s20  ;;  %428 = vrot.lane.b32.xlu1 %v1001_v18, %s785_s19 }
  0xbf   :  { %506 = vrot.lane.b32.xlu0 %v1001_v18, %s787_s21  ;;  %432 = vrot.lane.b32.xlu1 %v1016_v23, %s785_s19 }
  0xc3   :  { %510 = vrot.lane.b32.xlu0 %v1016_v23, %s787_s21  ;;  %469 = vrot.lane.b32.xlu1 %v1001_v18, %s786_s20 }
  0xc7   :  { %473 = vrot.lane.b32.xlu1 %v1016_v23, %s786_s20 }
  0xcb   :  { %475 = vrot.lane.b32.xlu1 %v1034_v28, %s786_s20 }
  0xcf   :  { %508 = vrot.lane.b32.xlu1 %v1003_v19, %s787_s21 }
  0xd3   :  { %512 = vrot.lane.b32.xlu1 %v1034_v28, %s787_s21 }
 0x101   :  { %v224_v4 = vpop.permute.xlu0 %223  ;;  %v226_v5 = vpop.permute.xlu1 %225 }
 0x102   :  { %v234_v43 = vsel %vm231_vm13, %v224_v4, %v226_v5 }
 0x103   :  { %v257_v18 = vmul.f32 %v992_v56, %v234_v43 }
 0x105   :  { %v230_v23 = vpop.permute.xlu0 %229  ;;  %v265_v60 = vpop.permute.xlu1 %264 }
 0x106   :  { %v235_v19 = vsel %vm231_vm13, %v230_v23, %v224_v4 }
 0x107   :  { %v256_v12 = vmul.f32 %v994_v15, %v235_v19 }
 0x109   :  { %v267_v56 = vpop.permute.xlu0 %266  ;;  %v271_v63 = vpop.permute.xlu1 %270 }
 0x10a   :  { %v275_v0 = vsel %vm272_vm6, %v265_v60, %v267_v56  ;;  %v276_v13 = vsel %vm272_vm6, %v271_v63, %v265_v60 }
 0x10b   :  { %v294_v51 = vmul.f32 %v290_v61, %v275_v0  ;;  %v293_v15 = vmul.f32 %v289_v62, %v276_v13 }
 0x10d   :  { %v298_v41 = vadd.f32 %v294_v51, %v257_v18  ;;  %v297_v40 = vadd.f32 %v293_v15, %v256_v12  ;;  %v269_v24 = vpop.permute.xlu0 %268  ;;  %v228_v27 = vpop.permute.xlu1 %227 }
 0x10e   :  { %v273_v26 = vsel %vm272_vm6, %v269_v24, %v271_v63  ;;  %v274_v37 = vsel %vm272_vm6, %v267_v56, %v269_v24  ;;  %v232_v46 = vsel %vm231_vm13, %v228_v27, %v230_v23  ;;  %v233_v4 = vsel %vm231_vm13, %v226_v5, %v228_v27 }
 0x10f   :  { %v295_v43 = vmul.f32 %v291_v47, %v274_v37  ;;  %v296_v18 = vmul.f32 %v1010_v7, %v273_v26  ;;  %v258_v57 = vmul.f32 %v1012_v8, %v233_v4  ;;  %v259_v60 = vmul.f32 %v1014_v22, %v232_v46 }
 0x111   :  { %v299_v19 = vadd.f32 %v295_v43, %v258_v57  ;;  %v300_v6 = vadd.f32 %v296_v18, %v259_v60  ;;  %v304_v54 = vpop.permute.xlu0 %303  ;;  %v302_v12 = vpop.permute.xlu1 %301 }
 0x112   :  { %v312_v61 = vsel %vm309_vm2, %v302_v12, %v304_v54 }
 0x113   :  { %v335_v56 = vmul.f32 %v1052_v33, %v312_v61 }
 0x115   :  { %v339_v23 = vadd.f32 %v335_v56, %v298_v41  ;;  %v345_v62 = vpop.permute.xlu0 %344  ;;  %v308_v63 = vpop.permute.xlu1 %307 }
 0x116   :  { %v313_v5 = vsel %vm309_vm2, %v308_v63, %v302_v12 }
 0x117   :  { %v334_v7 = vmul.f32 %v1054_v36, %v313_v5 }
 0x119   :  { %v338_v8 = vadd.f32 %v334_v7, %v297_v40  ;;  %v347_v22 = vpop.permute.xlu0 %346  ;;  %v306_v0 = vpop.permute.xlu1 %305 }
 0x11a   :  { %v352_v13 = vsel %vm350_vm9, %v345_v62, %v347_v22  ;;  %v310_v14 = vsel %vm309_vm2, %v306_v0, %v308_v63  ;;  %v311_v33 = vsel %vm309_vm2, %v304_v54, %v306_v0  ;;  %v683_v63 = vsel %vm441_vm7, 1.0, %v1472_v53 }
 0x11b   :  { %v373_v51 = vmul.f32 %v1083_v11, %v352_v13  ;;  %v336_v15 = vmul.f32 %v1059_v38, %v311_v33  ;;  %v337_v36 = vmul.f32 %v1068_v39, %v310_v14 }
 0x11d   :  { %v340_v41 = vadd.f32 %v336_v15, %v299_v19  ;;  %v341_v47 = vadd.f32 %v337_v36, %v300_v6  ;;  %v396_v40 = vpop.permute.xlu0 %395  ;;  %v343_v24 = vpop.permute.xlu1 %342 }
 0x11e   :  { %v353_v27 = vsel %vm350_vm9, %v343_v24, %v345_v62 }
 0x11f   :  { %v377_v26 = vadd.f32 %v373_v51, %v340_v41  ;;  %v372_v37 = vmul.f32 %v1085_v16, %v353_v27  ;;  %v1476_v51 = vld [vmem:[#allocation5_spill] sm:$0xff] }
 0x121   :  { %v376_v46 = vadd.f32 %v372_v37, %v339_v23  ;;  %v398_v4 = vpop.permute.xlu0 %397  ;;  %v389_v11 = vadd.f32 %v1046_v32, %v377_v26  ;;  %v349_v43 = vpop.permute.xlu1 %348  ;;  %v386_v32 = vmul.f32 %v1029_v25, %v1034_v28  ;;  %v687_v26 = vsel %vm211_vm5, 1.0, %v1472_v53 }
 0x122   :  { %v400_v38 = vsel %vm399_vm15, %v396_v40, %v398_v4  ;;  %v351_v39 = vsel %vm350_vm9, %v347_v22, %v349_v43  ;;  %v354_v18 = vsel %vm350_vm9, %v349_v43, %v343_v24  ;;  %v1475_v22 = vld [vmem:[#allocation4_spill] sm:$0xff]  ;;  %vm514_vm5 = vcmp.lt.s32.totalorder %v831_v21, 111 }
 0x123   :  { %v422_v57 = vmul.f32 %v1119_v45, %v400_v38  ;;  %v371_v16 = vmul.f32 %v1087_v17, %v354_v18  ;;  %v374_v60 = vmul.f32 %v1089_v20, %v351_v39  ;;  %v388_v19 = vadd.f32 %v1042_v30, %v376_v46  ;;  %v1477_v46 = vld [vmem:[#allocation6_spill] sm:$0xff]  ;;  %v1478_v39 = vld [vmem:[#allocation7_spill] sm:$0xff] }
 0x124   :  { %v457_v0 = vmul.f32 %v683_v63, %v1475_v22  ;;  %v494_v18 = vmul.f32 %v687_v26, %v1478_v39  ;;  %v1353_v21 = vadd.f32 %v1218_v3, %v1196_v49  ;;  %v1367_v49 = vadd.f32 %v1218_v3, %v1198_v52 }
 0x125   :  { %v426_v6 = vadd.f32 %v422_v57, %v389_v11  ;;  %v375_v54 = vadd.f32 %v371_v16, %v338_v8  ;;  %v378_v12 = vadd.f32 %v374_v60, %v341_v47  ;;  %v392_v61 = vpop.permute.xlu1 %391  ;;  %v431_v23 = vpop.permute.xlu0 %430  ;;  %v688_v60 = vsel %vm212_vm10, 1.0, %v1472_v53 }
 0x126   :  { %v403_v56 = vsel %vm399_vm15, %v398_v4, %v392_v61  ;;  %v611_v52 = vmul.f32 %v1353_v21, %v1353_v21  ;;  %v1390_v26 = vadd.f32 %v1218_v3, %v1200_v59 }
 0x127   :  { %v390_v62 = vadd.f32 %v386_v32, %v378_v12  ;;  %v423_v45 = vmul.f32 %v1121_v50, %v403_v56  ;;  %v387_v17 = vadd.f32 %v1038_v29, %v375_v54  ;;  %v495_v32 = vmul.f32 %v688_v60, %v1478_v39 }
 0x128   :  { %v613_v59 = vmul.f32 %v1390_v26, %v1390_v26 }
 0x129   :  { %v427_v30 = vadd.f32 %v423_v45, %v390_v62  ;;  %v394_v25 = vpop.permute.xlu1 %393  ;;  %v435_v29 = vpop.permute.xlu0 %434 }
 0x12a   :  { %v401_v28 = vsel %vm399_vm15, %v394_v25, %v396_v40  ;;  %v402_v20 = vsel %vm399_vm15, %v392_v61, %v394_v25  ;;  %v1479_v25 = vld [vmem:[#allocation8_spill] sm:$0xff] }
 0x12b   :  { %v420_v5 = vmul.f32 %v1123_v58, %v402_v20  ;;  %v421_v50 = vmul.f32 %v1125_v1, %v401_v28  ;;  %v684_v1 = vsel %vm442_vm3, 1.0, %v1472_v53 }
 0x12c   :  { %v458_v47 = vmul.f32 %v684_v1, %v1475_v22 }
 0x12d   :  { %v424_v7 = vadd.f32 %v420_v5, %v387_v17  ;;  %v425_v8 = vadd.f32 %v421_v50, %v388_v19  ;;  %v429_v13 = vpop.permute.xlu1 %428  ;;  %v472_v11 = vpop.permute.xlu0 %471 }
 0x12e   :  { %v439_v14 = vsel %vm436_vm8, %v429_v13, %v431_v23  ;;  %v440_v58 = vsel %vm436_vm8, %v435_v29, %v429_v13 }
 0x12f   :  { %v461_v33 = vmul.f32 %v457_v0, %v439_v14  ;;  %v464_v15 = vmul.f32 %v1476_v51, %v440_v58  ;;  %v1349_v0 = vadd.f32 %v1218_v3, %v1194_v48 }
 0x131   :  { %v465_v36 = vadd.f32 %v461_v33, %v424_v7  ;;  %v468_v41 = vadd.f32 %v464_v15, %v427_v30  ;;  %v433_v40 = vpop.permute.xlu1 %432  ;;  %v507_v61 = vpop.permute.xlu0 %506 }
 0x132   :  { %v437_v24 = vsel %vm436_vm8, %v433_v40, %v435_v29  ;;  %v438_v27 = vsel %vm436_vm8, %v431_v23, %v433_v40 }
 0x133   :  { %v462_v37 = vmul.f32 %v458_v47, %v438_v27  ;;  %v463_v4 = vmul.f32 %v1477_v46, %v437_v24 }
 0x135   :  { %v466_v43 = vadd.f32 %v462_v37, %v425_v8  ;;  %v467_v38 = vadd.f32 %v463_v4, %v426_v6  ;;  %v470_v57 = vpop.permute.xlu1 %469  ;;  %v689_v6 = vsel %vm213_vm4, 1.0, %v1472_v53  ;;  %v511_v20 = vpop.permute.xlu0 %510 }
 0x136   :  { %v480_v16 = vsel %vm477_vm1, %v470_v57, %v472_v11  ;;  %v496_v62 = vmul.f32 %v689_v6, %v1478_v39 }
 0x137   :  { %v498_v34 = vmul.f32 %v494_v18, %v480_v16  ;;  %v789_v16 = vmov 21  }
 0x138   :  { %750 = vset.pattern.permute.xlu0 %v789_v16 }
 0x139   :  { %v502_v19 = vadd.f32 %v498_v34, %v465_v36  ;;  %v474_v54 = vpop.permute.xlu1 %473  ;;  %v604_v36 = vadd.f32 %v1353_v21, %v1349_v0 }
 0x13a   :  { %v479_v12 = vsel %vm477_vm1, %v472_v11, %v474_v54 }
 0x13b   :  { %v499_v56 = vmul.f32 %v495_v32, %v479_v12  ;;  %v605_v37 = vadd.f32 %v604_v36, %v1367_v49 }
 0x13d   :  { %v503_v23 = vadd.f32 %v499_v56, %v466_v43  ;;  %v476_v45 = vpop.permute.xlu1 %475  ;;  %v606_v39 = vadd.f32 %v605_v37, %v1390_v26 }
 0x13e   :  { %v478_v31 = vsel %vm477_vm1, %v474_v54, %v476_v45  ;;  %v481_v17 = vsel %vm477_vm1, %v476_v45, %v470_v57  ;;  %v788_v57 = vmov 18  }
 0x13f   :  { %v500_v30 = vmul.f32 %v496_v62, %v478_v31  ;;  %v501_v28 = vmul.f32 %v1479_v25, %v481_v17  ;;  %748 = vset.pattern.permute.xlu1 %v788_v57  ;;  %v1480_v25 = vld [vmem:[#allocation2_spill] sm:$0xff] }
 0x141   :  { %v504_v35 = vadd.f32 %v500_v30, %v467_v38  ;;  %v505_v53 = vadd.f32 %v501_v28, %v468_v41  ;;  %v509_v63 = vpop.permute.xlu1 %508 }
 0x142   :  { %v516_v5 = vsel %vm514_vm5, %v509_v63, %v511_v20  ;;  %v517_v50 = vsel %vm514_vm5, %v507_v61, %v509_v63 }
 0x143   :  { %v539_v44 = vmul.f32 %v1176_v9, %v517_v50  ;;  %v540_v29 = vmul.f32 %v1178_v55, %v516_v5  ;;  %v790_v5 = vmov 19   ;;  %v791_v50 = vmov 22  }
 0x145   :  { %v543_v7 = vadd.f32 %v539_v44, %v502_v19  ;;  %v544_v8 = vadd.f32 %v540_v29, %v503_v23  ;;  %v513_v22 = vpop.permute.xlu1 %512  ;;  %v759_v29 = vld [vmem:[%s1428_s1] sm:$0xff] }
 0x146   :  { %v515_v13 = vsel %vm514_vm5, %v511_v20, %v513_v22  ;;  %v518_v14 = vsel %vm514_vm5, %v513_v22, %v507_v61 }
 0x147   :  { %v1356_v58 = vadd.f32 %v1216_v2, %v543_v7  ;;  %v1359_v9 = vadd.f32 %v1216_v2, %v544_v8  ;;  %v541_v55 = vmul.f32 %v1180_v42, %v515_v13  ;;  %v542_v1 = vmul.f32 %v1185_v10, %v518_v14 }
 0x148   :  { %v610_v42 = vmul.f32 %v1349_v0, %v1349_v0 }
 0x149   :  { %v545_v33 = vadd.f32 %v541_v55, %v504_v35  ;;  %v546_v51 = vadd.f32 %v542_v1, %v505_v53  ;;  %v561_v48 = vmul.f32 %v1356_v58, %v1356_v58  ;;  %v562_v15 = vmul.f32 %v1359_v9, %v1359_v9 }
 0x14a   :  { %v555_v47 = vadd.f32 %v1359_v9, %v1356_v58  ;;  %v614_v43 = vadd.f32 %v611_v52, %v610_v42 }
 0x14b   :  { %v1376_v10 = vadd.f32 %v1216_v2, %v545_v33  ;;  %v1379_v41 = vadd.f32 %v1216_v2, %v546_v51  ;;  %v565_v27 = vadd.f32 %v562_v15, %v561_v48  ;;  %v612_v2 = vmul.f32 %v1367_v49, %v1367_v49 }
 0x14d   :  { %v556_v40 = vadd.f32 %v555_v47, %v1376_v10  ;;  %v563_v24 = vmul.f32 %v1376_v10, %v1376_v10  ;;  %v564_v4 = vmul.f32 %v1379_v41, %v1379_v41  ;;  %v615_v3 = vadd.f32 %v614_v43, %v612_v2 }
 0x14f   :  { %v557_v46 = vadd.f32 %v556_v40, %v1379_v41  ;;  %v566_v11 = vadd.f32 %v565_v27, %v563_v24  ;;  %v616_v18 = vadd.f32 %v615_v3, %v613_v59 }
 0x151   :  { %558 = vadd.xlane.f32.xlu0 %v557_v46  ;;  %v567_v38 = vadd.f32 %v566_v11, %v564_v4 }
 0x153   :  { %568 = vadd.xlane.f32.xlu1 %v567_v38 }
 0x155   :  { %607 = vadd.xlane.f32.xlu0 %v606_v39 }
 0x159   :  { %617 = vadd.xlane.f32.xlu0 %v616_v18 }
 0x1de   :  { %v559_v60 = vpop.xlane.xlu0 %558 }
 0x1df   :  { %v560_v34 = vmul.f32 0.001953125, %v559_v60 }
 0x1e0   :  { %v569_v19 = vpop.xlane.xlu1 %568 }
 0x1e1   :  { %v571_v32 = vmul.f32 %v560_v34, %v560_v34  ;;  %v570_v54 = vmul.f32 0.001953125, %v569_v19 }
 0x1e2   :  { %v608_v12 = vpop.xlane.xlu0 %607 }
 0x1e3   :  { %v572_v6 = vsub.f32 %v570_v54, %v571_v32  ;;  %v609_v61 = vmul.f32 0.001953125, %v608_v12 }
 0x1e5   :  { %v573_v56 = vadd.f32 1e-05, %v572_v6  ;;  %v620_v62 = vmul.f32 %v609_v61, %v609_v61 }
 0x1e6   :  { %v618_v23 = vpop.xlane.xlu0 %617 }
 0x1e7   :  { %755 = vrsqrt.f32 %v573_v56  ;;  %v619_v45 = vmul.f32 0.001953125, %v618_v23 }
 0x1e9   :  { %v621_v31 = vsub.f32 %v619_v45, %v620_v62 }
 0x1eb   :  { %v622_v17 = vadd.f32 1e-05, %v621_v31 }
 0x1ed   :  { %757 = vrsqrt.f32 %v622_v17 }
 0x1f1   :  { %v756_v30 = vpop.eup %755 }
 0x1f2   :  { %v575_v28 = vmul.f32 %v756_v30, %v1480_v25 }
 0x1f4   :  { %v576_v20 = vmul.f32 %v575_v28, %v560_v34 }
 0x1f6   :  { %578 = vrot.lane.b32.xlu1 %v576_v20, %s783_s17 }
 0x1f7   :  { %v758_v35 = vpop.eup %757 }
 0x1f8   :  { %v624_v53 = vmul.f32 %v758_v35, %v1480_v25 }
 0x1fa   :  { %584 = vperm.xlu1 %748, %v575_v28   ;;  %v625_v63 = vmul.f32 %v624_v53, %v609_v61 }
 0x1fc   :  { %627 = vrot.lane.b32.xlu0 %v625_v63, %s783_s17 }
 0x1fe   :  { %749 = vset.pattern.permute.xlu1 %v790_v5 }
 0x200   :  { %633 = vperm.xlu0 %750, %v624_v53  }
 0x204   :  { %752 = vset.pattern.permute.xlu0 %v791_v50 }
 0x268   :  { %v579_v44 = vpop.permute.xlu1 %578 }
 0x269   :  { %v581_v7 = vsub.f32 %v759_v29, %v579_v44 }
 0x26b   :  { %593 = vperm.xlu1 %749, %v581_v7  }
 0x26e   :  { %v628_v8 = vpop.permute.xlu0 %627 }
 0x26f   :  { %v630_v22 = vsub.f32 %v759_v29, %v628_v8  ;;  %751 = vset.pattern.permute.xlu1 %v791_v50 }
 0x271   :  { %642 = vperm.xlu1 %751, %v630_v22  }
 0x279   :  { %v585_v13 = vpop.permute.xlu1 %584 }
 0x27a   :  { %v587_v14 = vmul.f32 %v585_v13, %v1356_v58  ;;  %v588_v55 = vmul.f32 %v585_v13, %v1359_v9  ;;  %v589_v1 = vmul.f32 %v585_v13, %v1376_v10  ;;  %v590_v33 = vmul.f32 %v585_v13, %v1379_v41 }
 0x27f   :  { %v634_v48 = vpop.permute.xlu0 %633 }
 0x280   :  { %v636_v52 = vmul.f32 %v634_v48, %v1349_v0  ;;  %v637_v40 = vmul.f32 %v634_v48, %v1353_v21  ;;  %v638_v24 = vmul.f32 %v634_v48, %v1367_v49  ;;  %v639_v58 = vmul.f32 %v634_v48, %v1390_v26 }
 0x2ea   :  { %v594_v51 = vpop.permute.xlu1 %593 }
 0x2eb   :  { %v596_v15 = vadd.f32 %v594_v51, %v587_v14  ;;  %v597_v36 = vadd.f32 %v594_v51, %v588_v55  ;;  %v598_v42 = vadd.f32 %v594_v51, %v589_v1  ;;  %v599_v47 = vadd.f32 %v594_v51, %v590_v33 }
 0x2ed   :  { %v600_v27 = vmax.f32 %v596_v15, 0.0  ;;  %v601_v9 = vmax.f32 %v597_v36, 0.0  ;;  %v602_v37 = vmax.f32 %v598_v42, 0.0  ;;  %v603_v10 = vmax.f32 %v599_v47, 0.0 }
 0x2f0   :  { %v643_v2 = vpop.permute.xlu1 %642 }
 0x2f1   :  { %v645_v41 = vadd.f32 %v643_v2, %v636_v52  ;;  %v646_v46 = vadd.f32 %v643_v2, %v637_v40  ;;  %v647_v4 = vadd.f32 %v643_v2, %v638_v24  ;;  %v648_v11 = vadd.f32 %v643_v2, %v639_v58 }
 0x2f3   :  { %v649_v43 = vadd.f32 %v645_v41, %v600_v27  ;;  %v650_v38 = vadd.f32 %v646_v46, %v601_v9  ;;  %v651_v39 = vadd.f32 %v647_v4, %v602_v37  ;;  %v652_v59 = vadd.f32 %v648_v11, %v603_v10 }
 0x2f5   :  { %653 = vst [vmem:[%s1430_s2] sm:$0xff] %v649_v43  ;;  %654 = vst [vmem:[%s1430_s2 + $0x8] sm:$0xff] %v650_v38 }
 0x2f6   :  { %695 = vst [vmem:[%s1430_s2 + $0x10] sm:$0xff] %v651_v39  ;;  %696 = vst [vmem:[%s1430_s2 + $0x18] sm:$0xff] %v652_v59 }

</bundles_post_ra>
